<compile_context>
chip_gen: v5e
topology: v5e:2x2
jax: 0.10.0
libtpu: 0.0.40
codegen_flags: <defaults>
</compile_context>

<pallas_src>
import jax
import jax.numpy as jnp
from jax.experimental import pallas as pl
from jax.experimental.pallas import tpu as pltpu

# --- model hyperparameters (match nn.Module defaults) ---
N_ARMS = 2
D_IN = 19
D_H = 32
D_H_ARM = 32
D_OUT = 1


def _round_up(n, m):
    return ((n + m - 1) // m) * m


def _mlp_fused_kernel(x_ref, w_tr_ref, b_tr_ref,
                      w1_ref, b1_ref, w2_ref, b2_ref, out_ref):
    """One batch tile (on lanes) per grid step; weights resident in VMEM.

    x_ref : (D_IN, TM)                 batch on lanes
    w_tr  : (D_H, D_IN),               b_tr : (D_H, 1)
    w1    : (N_ARMS*D_H_ARM, D_H),     b1   : (N_ARMS*D_H_ARM, 1)   (arms fused)
    w2    : (N_ARMS*D_OUT, N_ARMS*D_H_ARM)  block-diagonal^T,
    b2    : (N_ARMS*D_OUT, 1)
    out   : (N_ARMS*D_OUT, TM)         lane-dense arm outputs
    """
    x_t = x_ref[...]

    # common trunk: Linear(D_in, D_h) + ReLU   (Dropout = identity in eval)
    h = jnp.dot(w_tr_ref[...], x_t, preferred_element_type=jnp.float32)
    h = jnp.maximum(h + b_tr_ref[...], 0.0)                       # (D_H, TM)

    # both arm heads fused into two wide matmuls
    h1 = jnp.dot(w1_ref[...], h, preferred_element_type=jnp.float32)
    h1 = jnp.maximum(h1 + b1_ref[...], 0.0)                       # (2*D_H_ARM, TM)
    o = jnp.dot(w2_ref[...], h1, preferred_element_type=jnp.float32)
    out_ref[...] = (o + b2_ref[...]).astype(out_ref.dtype)        # (2*D_OUT, TM)


def _fuse_params(params):
    """Pre-fuse per-arm weights and transpose for the batch-on-lanes layout."""
    w_tr, b_tr, w1, b1, w2, b2 = params
    # trunk, transposed: (D_H, D_IN) / (D_H, 1)
    w_tr_t = w_tr.T
    b_tr_t = b_tr.T
    # heads layer 1, fused on the output axis then transposed: (2*D_H_ARM, D_H)
    w1_flat = jnp.concatenate([w1[a] for a in range(N_ARMS)], axis=1)      # (D_H, 2*D_H_ARM)
    w1_t = w1_flat.T
    b1_t = jnp.concatenate([b1[a] for a in range(N_ARMS)], axis=1).T       # (2*D_H_ARM, 1)
    # heads layer 2, block-diagonal then transposed: (2*D_OUT, 2*D_H_ARM)
    w2_blk = jnp.zeros((N_ARMS * D_H_ARM, N_ARMS * D_OUT), jnp.float32)
    for a in range(N_ARMS):
        w2_blk = w2_blk.at[a * D_H_ARM:(a + 1) * D_H_ARM,
                           a * D_OUT:(a + 1) * D_OUT].set(w2[a])
    w2_t = w2_blk.T
    b2_t = jnp.concatenate([b2[a] for a in range(N_ARMS)], axis=1).T       # (2*D_OUT, 1)
    return w_tr_t, b_tr_t, w1_t, b1_t, w2_t, b2_t


def mlp_multihead(x, params, *, tile_rows=2048):
    """x: (B, D_IN) float32. Returns list of n_arms arrays of shape (B, D_OUT)."""
    w_tr_t, b_tr_t, w1_t, b1_t, w2_t, b2_t = _fuse_params(params)
    B = x.shape[0]
    n_out = N_ARMS * D_OUT

    # batch-on-lanes layout: (D_IN, B)
    x_t = x.T

    # Lane tile: multiple of 128 (lane-dense), large enough to amortize the
    # per-grid-step overhead, capped so the grid keeps >= 2 steps (v7x 2 TCs).
    tile_rows = max(128, _round_up(tile_rows, 128))
    if B >= 128:
        tm = min(tile_rows, max(128, _round_up(pl.cdiv(B, 2), 128)))
    else:
        tm = B  # single block equal to the full (tiny) batch — always legal
    grid = (pl.cdiv(B, tm),)   # no jnp.pad: Pallas clips the ragged last block

    def const_spec(shape):
        # full-array block, same block every grid step -> stays resident in VMEM
        return pl.BlockSpec(shape, lambda i: (0,) * len(shape))

    out_t = pl.pallas_call(
        _mlp_fused_kernel,
        out_shape=jax.ShapeDtypeStruct((n_out, B), jnp.float32),
        grid=grid,
        in_specs=[
            pl.BlockSpec((D_IN, tm), lambda i: (0, i)),   # streamed batch tile
            const_spec(w_tr_t.shape),
            const_spec(b_tr_t.shape),
            const_spec(w1_t.shape),
            const_spec(b1_t.shape),
            const_spec(w2_t.shape),
            const_spec(b2_t.shape),
        ],
        out_specs=pl.BlockSpec((n_out, tm), lambda i: (0, i)),
        compiler_params=pltpu.CompilerParams(
            dimension_semantics=("parallel",)),           # v7x: shard batch over 2 TCs
    )(x_t, w_tr_t, b_tr_t, w1_t, b1_t, w2_t, b2_t)

    # (n_out, B) -> list of (B, D_OUT) per arm
    return [out_t[a * D_OUT:(a + 1) * D_OUT, :].T for a in range(N_ARMS)]


def init_params(key):
    """Deterministic init mimicking PyTorch Linear: U(-1/sqrt(fan_in), +1/sqrt(fan_in))."""
    ks = jax.random.split(key, 6)

    def u(k, shape, fan_in):
        bound = 1.0 / jnp.sqrt(float(fan_in))
        return jax.random.uniform(k, shape, jnp.float32, -bound, bound)

    w_tr = u(ks[0], (D_IN, D_H), D_IN)
    b_tr = u(ks[1], (1, D_H), D_IN)
    w1 = u(ks[2], (N_ARMS, D_H, D_H_ARM), D_H)
    b1 = u(ks[3], (N_ARMS, 1, D_H_ARM), D_H)
    w2 = u(ks[4], (N_ARMS, D_H_ARM, D_OUT), D_H_ARM)
    b2 = u(ks[5], (N_ARMS, 1, D_OUT), D_H_ARM)
    return (w_tr, b_tr, w1, b1, w2, b2)


def _reference(x, params):
    """Pure-JAX reference for verification (un-fused, per-arm, row-major)."""
    w_tr, b_tr, w1, b1, w2, b2 = params
    h = jnp.maximum(x @ w_tr + b_tr, 0.0)
    outs = []
    for arm in range(N_ARMS):
        h1 = jnp.maximum(h @ w1[arm] + b1[arm], 0.0)
        outs.append(h1 @ w2[arm] + b2[arm])
    return outs


if __name__ == "__main__":
    key = jax.random.PRNGKey(0)
    k_x, k_x2, k_p = jax.random.split(key, 3)
    params = init_params(k_p)

    # small primary test (single full-batch block path)
    batch = 8
    x = jax.random.normal(k_x, (batch, D_IN), dtype=jnp.float32)
    outs = mlp_multihead(x, params)
    outs = [jax.block_until_ready(o) for o in outs]
    refs = _reference(x, params)
    for o, r in zip(outs, refs):
        assert o.shape == (batch, D_OUT)
        assert jnp.allclose(o, r, atol=1e-5, rtol=1e-5)

    # multi-tile + ragged-tail test (exercises grid, edge-block clipping,
    # resident weights, lane-dense stores)
    batch2 = 300
    x2 = jax.random.normal(k_x2, (batch2, D_IN), dtype=jnp.float32)
    outs2 = mlp_multihead(x2, params, tile_rows=128)
    outs2 = [jax.block_until_ready(o) for o in outs2]
    refs2 = _reference(x2, params)
    for o, r in zip(outs2, refs2):
        assert o.shape == (batch2, D_OUT)
        assert jnp.allclose(o, r, atol=1e-5, rtol=1e-5)

    print("KERNEL_OK")
</pallas_src>

<mosaic_0001>
module attributes {stable_mosaic.version = 11 : i64} {
  func.func @_mlp_fused_kernel(%arg0: i32, %arg1: memref<19x8xf32, #tpu.memory_space<vmem>>, %arg2: memref<32x19xf32, #tpu.memory_space<vmem>>, %arg3: memref<32x1xf32, #tpu.memory_space<vmem>>, %arg4: memref<64x32xf32, #tpu.memory_space<vmem>>, %arg5: memref<64x1xf32, #tpu.memory_space<vmem>>, %arg6: memref<2x64xf32, #tpu.memory_space<vmem>>, %arg7: memref<2x1xf32, #tpu.memory_space<vmem>>, %arg8: memref<2x8xf32, #tpu.memory_space<vmem>>) attributes {dimension_semantics = [#tpu.dimension_semantics<parallel>], iteration_bounds = array<i64: 1>, scalar_prefetch = 0 : i64, scratch_operands = 0 : i64, tpu.core_type = #tpu.core_type<tc>, window_params = [{transform_indices = @transform_0, window_bounds = array<i64: 19, 8>}, {pipeline_mode = #tpu.pipeline_mode<synchronous>, transform_indices = @transform_1, window_bounds = array<i64: 32, 19>}, {pipeline_mode = #tpu.pipeline_mode<synchronous>, transform_indices = @transform_2, window_bounds = array<i64: 32, 1>}, {pipeline_mode = #tpu.pipeline_mode<synchronous>, transform_indices = @transform_3, window_bounds = array<i64: 64, 32>}, {pipeline_mode = #tpu.pipeline_mode<synchronous>, transform_indices = @transform_4, window_bounds = array<i64: 64, 1>}, {pipeline_mode = #tpu.pipeline_mode<synchronous>, transform_indices = @transform_5, window_bounds = array<i64: 2, 64>}, {pipeline_mode = #tpu.pipeline_mode<synchronous>, transform_indices = @transform_6, window_bounds = array<i64: 2, 1>}, {transform_indices = @transform_7, window_bounds = array<i64: 2, 8>}]} {
    %c0 = arith.constant 0 : index
    %c0_0 = arith.constant 0 : index
    %0 = vector.load %arg1[%c0, %c0_0] : memref<19x8xf32, #tpu.memory_space<vmem>>, vector<19x8xf32>
    %c0_1 = arith.constant 0 : index
    %c0_2 = arith.constant 0 : index
    %1 = vector.load %arg2[%c0_1, %c0_2] : memref<32x19xf32, #tpu.memory_space<vmem>>, vector<32x19xf32>
    %cst = arith.constant dense<0.000000e+00> : vector<32x8xf32>
    %2 = tpu.matmul %1, %0, %cst {dimension_numbers = #tpu.dot_dimension_numbers<[1], [0], [0], [1], [0, 0, 1, 1], [], []>} : vector<32x19xf32>, vector<19x8xf32>, vector<32x8xf32> -> vector<32x8xf32>
    %c0_3 = arith.constant 0 : index
    %c0_4 = arith.constant 0 : index
    %3 = vector.load %arg3[%c0_3, %c0_4] : memref<32x1xf32, #tpu.memory_space<vmem>>, vector<32x1xf32>
    %4 = vector.broadcast %3 : vector<32x1xf32> to vector<32x8xf32>
    %5 = arith.addf %2, %4 : vector<32x8xf32>
    %cst_5 = arith.constant 0.000000e+00 : f32
    %6 = vector.broadcast %cst_5 : f32 to vector<32x8xf32>
    %7 = arith.maximumf %5, %6 : vector<32x8xf32>
    %c0_6 = arith.constant 0 : index
    %c0_7 = arith.constant 0 : index
    %8 = vector.load %arg4[%c0_6, %c0_7] : memref<64x32xf32, #tpu.memory_space<vmem>>, vector<64x32xf32>
    %cst_8 = arith.constant dense<0.000000e+00> : vector<64x8xf32>
    %9 = tpu.matmul %8, %7, %cst_8 {dimension_numbers = #tpu.dot_dimension_numbers<[1], [0], [0], [1], [0, 0, 1, 1], [], []>} : vector<64x32xf32>, vector<32x8xf32>, vector<64x8xf32> -> vector<64x8xf32>
    %c0_9 = arith.constant 0 : index
    %c0_10 = arith.constant 0 : index
    %10 = vector.load %arg5[%c0_9, %c0_10] : memref<64x1xf32, #tpu.memory_space<vmem>>, vector<64x1xf32>
    %11 = vector.broadcast %10 : vector<64x1xf32> to vector<64x8xf32>
    %12 = arith.addf %9, %11 : vector<64x8xf32>
    %cst_11 = arith.constant 0.000000e+00 : f32
    %13 = vector.broadcast %cst_11 : f32 to vector<64x8xf32>
    %14 = arith.maximumf %12, %13 : vector<64x8xf32>
    %c0_12 = arith.constant 0 : index
    %c0_13 = arith.constant 0 : index
    %15 = vector.load %arg6[%c0_12, %c0_13] : memref<2x64xf32, #tpu.memory_space<vmem>>, vector<2x64xf32>
    %cst_14 = arith.constant dense<0.000000e+00> : vector<2x8xf32>
    %16 = tpu.matmul %15, %14, %cst_14 {dimension_numbers = #tpu.dot_dimension_numbers<[1], [0], [0], [1], [0, 0, 1, 1], [], []>} : vector<2x64xf32>, vector<64x8xf32>, vector<2x8xf32> -> vector<2x8xf32>
    %c0_15 = arith.constant 0 : index
    %c0_16 = arith.constant 0 : index
    %17 = vector.load %arg7[%c0_15, %c0_16] : memref<2x1xf32, #tpu.memory_space<vmem>>, vector<2x1xf32>
    %18 = vector.broadcast %17 : vector<2x1xf32> to vector<2x8xf32>
    %19 = arith.addf %16, %18 : vector<2x8xf32>
    %c0_17 = arith.constant 0 : index
    %c0_18 = arith.constant 0 : index
    %20 = vector.load %arg8[%c0_17, %c0_18] : memref<2x8xf32, #tpu.memory_space<vmem>>, vector<2x8xf32>
    tpu.vector_store %arg8[%c0_17, %c0_18], %19 {strides = array<i32>} : memref<2x8xf32, #tpu.memory_space<vmem>>, vector<2x8xf32>,
    return
  }
  func.func @transform_0(%arg0: i32) -> (i32, i32) {
    %c0_i32 = arith.constant 0 : i32
    %c0_i32_0 = arith.constant 0 : i32
    return %c0_i32, %arg0 : i32, i32
  }
  func.func @transform_1(%arg0: i32) -> (i32, i32) {
    %c0_i32 = arith.constant 0 : i32
    %c0_i32_0 = arith.constant 0 : i32
    %c0_i32_1 = arith.constant 0 : i32
    return %c0_i32, %c0_i32_0 : i32, i32
  }
  func.func @transform_2(%arg0: i32) -> (i32, i32) {
    %c0_i32 = arith.constant 0 : i32
    %c0_i32_0 = arith.constant 0 : i32
    %c0_i32_1 = arith.constant 0 : i32
    return %c0_i32, %c0_i32_0 : i32, i32
  }
  func.func @transform_3(%arg0: i32) -> (i32, i32) {
    %c0_i32 = arith.constant 0 : i32
    %c0_i32_0 = arith.constant 0 : i32
    %c0_i32_1 = arith.constant 0 : i32
    return %c0_i32, %c0_i32_0 : i32, i32
  }
  func.func @transform_4(%arg0: i32) -> (i32, i32) {
    %c0_i32 = arith.constant 0 : i32
    %c0_i32_0 = arith.constant 0 : i32
    %c0_i32_1 = arith.constant 0 : i32
    return %c0_i32, %c0_i32_0 : i32, i32
  }
  func.func @transform_5(%arg0: i32) -> (i32, i32) {
    %c0_i32 = arith.constant 0 : i32
    %c0_i32_0 = arith.constant 0 : i32
    %c0_i32_1 = arith.constant 0 : i32
    return %c0_i32, %c0_i32_0 : i32, i32
  }
  func.func @transform_6(%arg0: i32) -> (i32, i32) {
    %c0_i32 = arith.constant 0 : i32
    %c0_i32_0 = arith.constant 0 : i32
    %c0_i32_1 = arith.constant 0 : i32
    return %c0_i32, %c0_i32_0 : i32, i32
  }
  func.func @transform_7(%arg0: i32) -> (i32, i32) {
    %c0_i32 = arith.constant 0 : i32
    %c0_i32_0 = arith.constant 0 : i32
    return %c0_i32, %arg0 : i32, i32
  }
}

</mosaic_0001>

<bundles_post_ra>
// kernel: tpu_custom_call.1
= control target key start
LH: loop header
LB: loop body
LE: loop exit
PB: predicated region body
PF: predicated region fallthrough
CT: control target
= control target key end

     0   :  { %vm71_vm0 = vcmask 1042432   ;;  %v336_v3 = vmov 0   ;;  %vm58_vm1 = vcmask 154624   ;;  %s480_s0 = inlined_call_operand.vmem [shape: f32[19,8], index: 0, kind: input, shape index: {}]   ;;  %s481_s1 = inlined_call_operand.vmem [shape: f32[32,19], index: 1, kind: input, shape index: {}]   ;;  %s482_s2 = inlined_call_operand.vmem [shape: f32[32,1], index: 2, kind: input, shape index: {}]   ;;  %s483_s3 = inlined_call_operand.vmem [shape: f32[64,32], index: 3, kind: input, shape index: {}]   ;;  %s484_s4 = inlined_call_operand.vmem [shape: f32[64,1], index: 4, kind: input, shape index: {}]   ;;  %s485_s5 = inlined_call_operand.vmem [shape: f32[2,64], index: 5, kind: input, shape index: {}]   ;;  %s486_s6 = inlined_call_operand.vmem [shape: f32[2,1], index: 6, kind: input, shape index: {}]   ;;  %s487_s7 = inlined_call_operand.hbm [shape: f32[2,8], index: 7, kind: output, shape index: {}]  }
   0x1   :  { %v29_v0 = vld [vmem:[%s480_s0 + $0x10] sm:$0x7]  ;;  %v37_v1 = vld [vmem:[%s482_s2 + $0x18] sm:$0xff]  ;;  %v28_v2 = vld [vmem:[%s480_s0 + $0x8] sm:$0xff]  ;;  %307 = vset.pattern.permute.xlu0 %v336_v3  ;;  %308 = vset.pattern.permute.xlu1 %v336_v3 }
   0x2   :  { %287 = vmatpush.msk.msra.mxu0 %vm71_vm0, %v29_v0  ;;  %v35_v4 = vld [vmem:[%s482_s2 + $0x8] sm:$0xff]  ;;  %55 = vperm.xlu0 %307, %v37_v1   ;;  %v27_v5 = vld [vmem:[%s480_s0] sm:$0xff] }
   0x3   :  { %v30_v6 = vld [vmem:[%s481_s1] sm:$0xff]  ;;  %45 = vperm.xlu1 %308, %v35_v4   ;;  %309 = vset.pattern.permute.xlu2 %v336_v3 }
   0x4   :  { %89 = vmatpush.msra.mxu0 %v28_v2 }
   0x6   :  { %90 = vmatpush.msra.mxu0 %v27_v5 }
   0x7   :  { %12 = vsyncpa [#allocation3], 0  ;;  %288 = vmatmul.msk.f32.vlgmr.msra.gmra.mxu0 %vm58_vm1, %v30_v6  ;;  %v36_v7 = vld [vmem:[%s482_s2 + $0x10] sm:$0xff]  ;;  %v34_v8 = vld [vmem:[%s482_s2] sm:$0xff]  ;;  %vm164_vm2 = vcmask 261120   ;;  %vm245_vm3 = vcmask 523264  }
   0x8   :  { %v31_v9 = vld [vmem:[%s481_s1 + $0x8] sm:$0xff]  ;;  %v120_v11 = vld [vmem:[%s484_s4 + $0x20] sm:$0xff]  ;;  %v32_v12 = vld [vmem:[%s481_s1 + $0x10] sm:$0xff]  ;;  %s337_s28 = smov [#allocation2]   ;;  %s278_s8 = sshll.u32 %s487_s7, 4  ;;  %vm269_vm4 = vcmask 58368   ;;  %s279_s8 = int_to_ptr.hbm [resolvable:$true] %s278_s8 }
   0x9   :  { %v121_v10 = vld [vmem:[%s484_s4 + $0x28] sm:$0xff]  ;;  %v118_v13 = vld [vmem:[%s484_s4 + $0x10] sm:$0xff]  ;;  %v33_v15 = vld [vmem:[%s481_s1 + $0x18] sm:$0xff]  ;;  %s276_s29 = sshll.u32 %s337_s28, 4  ;;  %s277_s29 = int_to_ptr.vmem [resolvable:$true] %s276_s29 }
   0xa   :  { %50 = vperm.xlu0 %307, %v36_v7   ;;  %v117_v14 = vld [vmem:[%s484_s4 + $0x8] sm:$0xff]  ;;  %v239_v16 = vld [vmem:[%s486_s6] sm:$0x3]  ;;  %v123_v29 = vld [vmem:[%s484_s4 + $0x38] sm:$0xff] }
   0xb   :  { %40 = vperm.xlu1 %308, %v34_v8   ;;  %161 = vperm.xlu2 %309, %v123_v29   ;;  %v108_v34 = vld [vmem:[%s483_s3] sm:$0xff]  ;;  %v122_v36 = vld [vmem:[%s484_s4 + $0x30] sm:$0xff]  ;;  %v109_v37 = vld [vmem:[%s483_s3 + $0x8] sm:$0xff] }
   0xc   :  { %v112_v35 = vld [vmem:[%s483_s3 + $0x20] sm:$0xff]  ;;  %v113_v38 = vld [vmem:[%s483_s3 + $0x28] sm:$0xff]  ;;  %v119_v39 = vld [vmem:[%s484_s4 + $0x18] sm:$0xff] }
   0xd   :  { %v110_v40 = vld [vmem:[%s483_s3 + $0x10] sm:$0xff]  ;;  %v116_v42 = vld [vmem:[%s484_s4] sm:$0xff]  ;;  %v111_v43 = vld [vmem:[%s483_s3 + $0x18] sm:$0xff] }
   0xe   :  { %v114_v41 = vld [vmem:[%s483_s3 + $0x30] sm:$0xff]  ;;  %v115_v44 = vld [vmem:[%s483_s3 + $0x38] sm:$0xff] }
   0xf   :  { %289 = vmatmul.msk.f32.gmra.mxu0 %vm58_vm1, %v31_v9 }
  0x12   :  { %151 = vperm.xlu0 %307, %v121_v10  }
  0x13   :  { %146 = vperm.xlu1 %308, %v120_v11   ;;  %156 = vperm.xlu2 %309, %v122_v36  }
  0x17   :  { %290 = vmatmul.msk.f32.gmra.mxu0 %vm58_vm1, %v32_v12 }
  0x1a   :  { %136 = vperm.xlu0 %307, %v118_v13   ;;  %v238_v13 = vld [vmem:[%s485_s5] sm:$0x3] }
  0x1b   :  { %131 = vperm.xlu1 %308, %v117_v14   ;;  %141 = vperm.xlu2 %309, %v119_v39  }
  0x1f   :  { %291 = vmatmul.msk.f32.gmra.mxu0 %vm58_vm1, %v33_v15 }
  0x22   :  { %242 = vperm.xlu0 %307, %v239_v16  }
  0x23   :  { %126 = vperm.xlu2 %309, %v116_v42  }
  0x65   :  { %v162_v47 = vpop.permute.xlu2 %161 }
  0x6d   :  { %v157_v50 = vpop.permute.xlu2 %156 }
  0x74   :  { %v56_v19 = vpop.permute.xlu0 %55 }
  0x75   :  { %v46_v20 = vpop.permute.xlu1 %45  ;;  %v142_v55 = vpop.permute.xlu2 %141 }
  0x7c   :  { %v51_v22 = vpop.permute.xlu0 %50 }
  0x7d   :  { %v41_v26 = vpop.permute.xlu1 %40  ;;  %v127_v6 = vpop.permute.xlu2 %126 }
  0x84   :  { %v92_v17 = vpop.f32.mrf.mxu0  ;;  %v152_v53 = vpop.permute.xlu0 %151 }
  0x85   :  { %v93_v30 = vadd.f32 %v92_v17, %v41_v26  ;;  %v147_v54 = vpop.permute.xlu1 %146 }
  0x87   :  { %v104_v33 = vmax.f32 %v93_v30, 0.0 }
  0x8c   :  { %v95_v18 = vpop.f32.mrf.mxu0  ;;  %v137_v2 = vpop.permute.xlu0 %136 }
  0x8d   :  { %v96_v27 = vadd.f32 %v95_v18, %v46_v20  ;;  %v132_v5 = vpop.permute.xlu1 %131 }
  0x8f   :  { %v105_v32 = vmax.f32 %v96_v27, 0.0 }
  0x94   :  { %v98_v21 = vpop.f32.mrf.mxu0  ;;  %v243_v14 = vpop.permute.xlu0 %242 }
  0x95   :  { %v99_v24 = vadd.f32 %v98_v21, %v51_v22 }
  0x97   :  { %v106_v31 = vmax.f32 %v99_v24, 0.0 }
  0x9c   :  { %v101_v23 = vpop.f32.mrf.mxu0 }
  0x9d   :  { %v102_v25 = vadd.f32 %v101_v23, %v56_v19 }
  0x9f   :  { %v107_v28 = vmax.f32 %v102_v25, 0.0 }
  0xa1   :  { %201 = vmatpush.msra.mxu1 %v107_v28  ;;  %301 = vmatpush.msra.mxu3 %v107_v28 }
  0xa3   :  { %202 = vmatpush.msra.mxu1 %v106_v31  ;;  %302 = vmatpush.msra.mxu3 %v106_v31 }
  0xa5   :  { %203 = vmatpush.msra.mxu1 %v105_v32  ;;  %303 = vmatpush.msra.mxu3 %v105_v32 }
  0xa7   :  { %204 = vmatpush.msra.mxu1 %v104_v33  ;;  %304 = vmatpush.msra.mxu3 %v104_v33 }
  0xa8   :  { %292 = vmatmul.msk.f32.vlgmr.msra.gmra.mxu1 %vm164_vm2, %v108_v34  ;;  %296 = vmatmul.msk.f32.vlgmr.msra.gmra.mxu3 %vm164_vm2, %v112_v35 }
  0xb0   :  { %293 = vmatmul.msk.f32.gmra.mxu1 %vm164_vm2, %v109_v37  ;;  %297 = vmatmul.msk.f32.gmra.mxu3 %vm164_vm2, %v113_v38 }
  0xb8   :  { %294 = vmatmul.msk.f32.gmra.mxu1 %vm164_vm2, %v110_v40  ;;  %298 = vmatmul.msk.f32.gmra.mxu3 %vm164_vm2, %v114_v41 }
  0xc0   :  { %295 = vmatmul.msk.f32.gmra.mxu1 %vm164_vm2, %v111_v43  ;;  %299 = vmatmul.msk.f32.gmra.mxu3 %vm164_vm2, %v115_v44 }
 0x125   :  { %v206_v45 = vpop.f32.mrf.mxu1 }
 0x126   :  { %v207_v9 = vadd.f32 %v206_v45, %v127_v6 }
 0x128   :  { %v230_v12 = vmax.f32 %v207_v9, 0.0 }
 0x12b   :  { %v218_v46 = vpop.f32.mrf.mxu3 }
 0x12c   :  { %v219_v62 = vadd.f32 %v218_v46, %v147_v54 }
 0x12d   :  { %v209_v48 = vpop.f32.mrf.mxu1 }
 0x12e   :  { %v234_v3 = vmax.f32 %v219_v62, 0.0  ;;  %v210_v7 = vadd.f32 %v209_v48, %v132_v5 }
 0x130   :  { %v231_v11 = vmax.f32 %v210_v7, 0.0 }
 0x133   :  { %v221_v49 = vpop.f32.mrf.mxu3 }
 0x134   :  { %v222_v59 = vadd.f32 %v221_v49, %v152_v53 }
 0x135   :  { %v212_v52 = vpop.f32.mrf.mxu1 }
 0x136   :  { %v235_v0 = vmax.f32 %v222_v59, 0.0  ;;  %v213_v4 = vadd.f32 %v212_v52, %v137_v2 }
 0x138   :  { %v232_v10 = vmax.f32 %v213_v4, 0.0 }
 0x13b   :  { %v224_v51 = vpop.f32.mrf.mxu3 }
 0x13c   :  { %v225_v57 = vadd.f32 %v224_v51, %v157_v50 }
 0x13d   :  { %v215_v61 = vpop.f32.mrf.mxu1 }
 0x13e   :  { %v236_v63 = vmax.f32 %v225_v57, 0.0  ;;  %v216_v1 = vadd.f32 %v215_v61, %v142_v55 }
 0x140   :  { %v233_v8 = vmax.f32 %v216_v1, 0.0 }
 0x143   :  { %v227_v56 = vpop.f32.mrf.mxu3 }
 0x144   :  { %v228_v58 = vadd.f32 %v227_v56, %v162_v47 }
 0x146   :  { %v237_v60 = vmax.f32 %v228_v58, 0.0 }
 0x148   :  { %257 = vmatpush.msra.mxu2 %v237_v60 }
 0x14a   :  { %258 = vmatpush.msra.mxu2 %v236_v63 }
 0x14c   :  { %259 = vmatpush.msra.mxu2 %v235_v0 }
 0x14e   :  { %260 = vmatpush.msra.mxu2 %v234_v3 }
 0x150   :  { %261 = vmatpush.msra.mxu2 %v233_v8 }
 0x152   :  { %262 = vmatpush.msra.mxu2 %v232_v10 }
 0x154   :  { %263 = vmatpush.msra.mxu2 %v231_v11 }
 0x156   :  { %264 = vmatpush.msra.mxu2 %v230_v12 }
 0x157   :  { %300 = vmatmul.msk.f32.vlgmr.msra.gmra.mxu2 %vm245_vm3, %v238_v13 }
 0x1da   :  { %v266_v15 = vpop.f32.mrf.mxu2 }
 0x1db   :  { %v267_v16 = vadd.f32 %v266_v15, %v243_v14 }
 0x1dd   :  { %270 = vst.msk [vmem:[#allocation2] sm:$0x3] %vm269_vm4, %v267_v16 }
 0x1de   :  { %281 = dma.vmem_to_hbm [thread:$0]  %s277_s29, 32, %s279_s8, [#allocation3]  }
 0x1df   :  { %334 = dma.done.wait [#allocation3], 32  }
 0x1e0   :  { %335 = vsyncadd [#allocation3], 4294967264 }
 0x1e1   :  { %286 = vsyncpa [#allocation3], 1 }

</bundles_post_ra>
